<compile_context>
chip_gen: v7x
topology: tpu7x:2x2x1
jax: 0.10.0
libtpu: 0.0.40
codegen_flags: <defaults>
</compile_context>

<pallas_src>
import functools

import jax
import jax.numpy as jnp
from jax.experimental import pallas as pl
from jax.experimental.pallas import tpu as pltpu


BN_EPS = 1e-5


def _round_up(n, m):
    return (n + m - 1) // m * m


def _pad_dim(n):
    """Lane-align a feature dim: 256-multiples once >= 256 (v6e/v7x MXU width),
    otherwise 128-multiples (vreg lane width, v5e MXU width)."""
    return _round_up(n, 256) if n >= 256 else _round_up(n, 128)


def _vmem_capacity_bytes():
    try:
        return int(pltpu.get_tpu_info().vmem_capacity_bytes)
    except Exception:
        return 64 * 1024 * 1024  # conservative fallback: v7x per-core VMEM


# ----------------------------------------------------------------------------
# Kernels
# ----------------------------------------------------------------------------

def _encoder_kernel(compute_dtype, x_ref, w0_ref, b0_ref,
                    gamma_ref, beta_ref, w_ref, b_ref, out_ref, h_ref):
    """One grid step = one hidden layer: [first Linear at step 0] ->
    BatchNorm1d(train) -> ReLU -> Linear.

    h_ref is a persistent f32 VMEM scratch carrying the activation across grid
    steps; gamma/beta/w/b are streamed per step by their BlockSpecs (so Pallas
    prefetches layer l+1's weight while layer l computes).  x / w0 / b0 have
    constant block indices -> DMA'd once and kept resident.
    """
    layer = pl.program_id(0)

    @pl.when(layer == 0)
    def _():
        # First linear: (B, in_pad) @ (in_pad, emb_pad) on the MXU, f32 acc.
        h_ref[...] = jnp.dot(x_ref[...], w0_ref[...],
                             preferred_element_type=jnp.float32) + b0_ref[...]

    h = h_ref[...]

    # --- BatchNorm1d (training mode, biased variance), fused single pass ----
    mean = jnp.mean(h, axis=0, keepdims=True)            # (1, emb_pad)
    mean_sq = jnp.mean(h * h, axis=0, keepdims=True)     # (1, emb_pad)
    var = jnp.maximum(mean_sq - mean * mean, 0.0)        # clamp: no NaN on cancellation
    inv_std = jax.lax.rsqrt(var + BN_EPS)                # EUP slot
    scale = inv_std * gamma_ref[...]
    shift = beta_ref[...] - mean * scale
    h = jnp.maximum(h * scale + shift, 0.0)              # BN + ReLU on the VPU

    # --- Linear(emb, emb): pre-transposed bf16 weight, MXU, f32 accumulation --
    h_new = jnp.dot(h.astype(compute_dtype), w_ref[...],
                    preferred_element_type=jnp.float32) + b_ref[...]
    h_ref[...] = h_new

    @pl.when(layer == pl.num_programs(0) - 1)
    def _():
        out_ref[...] = h_new.astype(out_ref.dtype)


def _linear_only_kernel(x_ref, w0_ref, b0_ref, out_ref):
    """encoder_num_layers == 1 degenerate case: a single Linear."""
    out_ref[...] = (jnp.dot(x_ref[...], w0_ref[...],
                            preferred_element_type=jnp.float32)
                    + b0_ref[...]).astype(out_ref.dtype)


# ----------------------------------------------------------------------------
# Parameter preparation (one-time; hoisted out of the per-call path)
# ----------------------------------------------------------------------------

def prepare_params(params, *, compute_dtype=jnp.bfloat16):
    """One-time parameter prep (keep the result and reuse it every forward).

    PyTorch (out, in) weights -> pre-transposed (in, out), zero-padded to
    lane-aligned dims, cast to the MXU compute dtype.  Biases / BN params
    become zero-padded (1, emb_pad) f32 rows (the zero padding keeps padded
    lanes exactly zero through Linear/BN/ReLU).  Hidden-layer params are
    stacked along a leading axis so the kernel can stream them per grid step.
    """
    w0 = jnp.asarray(params["w0"], jnp.float32)
    emb, input_size = w0.shape
    num_hidden = len(params["ws"])
    in_pad = _pad_dim(input_size)
    emb_pad = _pad_dim(emb)

    def pad_row(v):
        v = jnp.asarray(v, jnp.float32).reshape(1, -1)
        assert v.shape[1] == emb, "params must arrive with logical (unpadded) width"
        return jnp.pad(v, ((0, 0), (0, emb_pad - emb)))

    def pad_weight(w, rows_logical, rows_pad):
        wt = jnp.asarray(w, jnp.float32).T               # (in, out)
        assert wt.shape == (rows_logical, emb), "weight must be PyTorch (out, in) layout"
        wt = jnp.pad(wt, ((0, rows_pad - rows_logical), (0, emb_pad - emb)))
        return wt.astype(compute_dtype)

    if num_hidden:
        gammas = jnp.stack([pad_row(g) for g in params["gammas"]])
        betas = jnp.stack([pad_row(b) for b in params["betas"]])
        ws = jnp.stack([pad_weight(w, emb, emb_pad) for w in params["ws"]])
        bs = jnp.stack([pad_row(b) for b in params["bs"]])
    else:
        gammas = jnp.zeros((0, 1, emb_pad), jnp.float32)
        betas = jnp.zeros((0, 1, emb_pad), jnp.float32)
        ws = jnp.zeros((0, emb_pad, emb_pad), compute_dtype)
        bs = jnp.zeros((0, 1, emb_pad), jnp.float32)

    return {
        "w0": pad_weight(params["w0"], input_size, in_pad),   # (in_pad, emb_pad) bf16
        "b0": pad_row(params["b0"]),                           # (1, emb_pad)     f32
        "gammas": gammas,                                      # (L, 1, emb_pad)  f32
        "betas": betas,                                        # (L, 1, emb_pad)  f32
        "ws": ws,                                              # (L, emb_pad, emb_pad) bf16
        "bs": bs,                                              # (L, 1, emb_pad)  f32
    }


# ----------------------------------------------------------------------------
# Forward wrapper (jit this; embedding_dim is static)
# ----------------------------------------------------------------------------

def tabular_encoder_forward(x, prepared, *, embedding_dim):
    """Fused MLP tabular encoder forward.

    x: (batch, input_size) float32.  `prepared` comes from prepare_params().
    Wrap in jax.jit(..., static_argnames=("embedding_dim",)) so the x pad/cast
    and the output lane-strip fuse with neighboring ops.
    """
    w0, b0 = prepared["w0"], prepared["b0"]
    gammas, betas = prepared["gammas"], prepared["betas"]
    ws, bs = prepared["ws"], prepared["bs"]
    num_hidden = ws.shape[0]
    in_pad, emb_pad = w0.shape
    batch, input_size = x.shape
    compute_dtype = w0.dtype
    itemsize = jnp.dtype(compute_dtype).itemsize

    # bf16 x: halves the largest activation DMA and drops the in-kernel cast.
    x_pad = jnp.pad(x.astype(compute_dtype),
                    ((0, 0), (0, in_pad - input_size)))

    out_shape = jax.ShapeDtypeStruct((batch, emb_pad), jnp.float32)

    if num_hidden == 0:
        vmem_spec = pl.BlockSpec(memory_space=pltpu.MemorySpace.VMEM)
        out_pad = pl.pallas_call(
            _linear_only_kernel,
            out_shape=out_shape,
            in_specs=[vmem_spec] * 3,
            out_specs=vmem_spec,
        )(x_pad, w0, b0)
        return out_pad[:, :embedding_dim]

    # --- VMEM budget: full batch + ~2 weight tiles resident (weights stream) --
    resident = 2 * (batch * in_pad * itemsize        # x (double-buffered)
                    + in_pad * emb_pad * itemsize    # w0
                    + emb_pad * 4                    # b0
                    + 3 * emb_pad * 4                # gamma/beta/bias tiles
                    + emb_pad * emb_pad * itemsize   # streamed hidden weight
                    + batch * emb_pad * 4)           # output block
    resident += batch * emb_pad * 4                  # persistent h scratch
    resident += 3 * batch * emb_pad * 4              # in-kernel f32 temporaries
    capacity = _vmem_capacity_bytes()
    if resident > capacity - (8 << 20):
        # TODO(synk): batch-tiled two-pass BN (sum/sumsq accumulator over an
        # 'arbitrary' batch grid axis, HBM-resident h) for footprints > VMEM.
        raise ValueError(
            f"Resident footprint {resident} B exceeds VMEM capacity "
            f"{capacity} B; a batch-tiled two-pass BN variant is required.")
    vmem_limit = min(capacity - (4 << 20),
                     max(resident + (8 << 20), 32 << 20))

    flops = (2 * batch * emb_pad * in_pad
             + num_hidden * (2 * batch * emb_pad * emb_pad
                             + 10 * batch * emb_pad))
    bytes_accessed = (x_pad.size * itemsize
                      + w0.size * itemsize + ws.size * itemsize
                      + (b0.size + bs.size + gammas.size + betas.size) * 4
                      + batch * emb_pad * 4)
    cost = pl.CostEstimate(flops=int(flops),
                           transcendentals=int(num_hidden * emb_pad),
                           bytes_accessed=int(bytes_accessed))

    out_pad = pl.pallas_call(
        functools.partial(_encoder_kernel, compute_dtype),
        out_shape=out_shape,
        grid=(num_hidden,),
        in_specs=[
            # Resident across all layers (constant block index -> single DMA).
            pl.BlockSpec((batch, in_pad), lambda l: (0, 0)),
            pl.BlockSpec((in_pad, emb_pad), lambda l: (0, 0)),
            pl.BlockSpec((1, emb_pad), lambda l: (0, 0)),
            # Streamed per hidden layer (double-buffered by the pipeline).
            pl.BlockSpec((None, 1, emb_pad), lambda l: (l, 0, 0)),       # gamma
            pl.BlockSpec((None, 1, emb_pad), lambda l: (l, 0, 0)),       # beta
            pl.BlockSpec((None, emb_pad, emb_pad), lambda l: (l, 0, 0)),  # W
            pl.BlockSpec((None, 1, emb_pad), lambda l: (l, 0, 0)),       # b
        ],
        out_specs=pl.BlockSpec((batch, emb_pad), lambda l: (0, 0)),
        scratch_shapes=[pltpu.VMEM((batch, emb_pad), jnp.float32)],
        compiler_params=pltpu.CompilerParams(
            dimension_semantics=("arbitrary",),
            vmem_limit_bytes=int(vmem_limit)),
        cost_estimate=cost,
    )(x_pad, w0, b0, gammas, betas, ws, bs)

    # Strip lane padding back to the logical embedding width (fuses under jit).
    return out_pad[:, :embedding_dim]


# ----------------------------------------------------------------------------
# Init + pure-JAX reference (PyTorch semantics)
# ----------------------------------------------------------------------------

def init_params(key, input_size, embedding_dim, encoder_num_layers):
    """init_strat='normal': W ~ N(0, 0.001), b = 0.  BatchNorm: gamma=1, beta=0
    (PyTorch defaults).  Weights in PyTorch (out, in) layout."""
    num_hidden = encoder_num_layers - 1
    keys = jax.random.split(key, 1 + max(num_hidden, 1))
    params = {
        "w0": (jax.random.normal(keys[0], (embedding_dim, input_size),
                                 jnp.float32) * 0.001),
        "b0": jnp.zeros((1, embedding_dim), jnp.float32),
        "gammas": [], "betas": [], "ws": [], "bs": [],
    }
    for i in range(num_hidden):
        params["gammas"].append(jnp.ones((1, embedding_dim), jnp.float32))
        params["betas"].append(jnp.zeros((1, embedding_dim), jnp.float32))
        params["ws"].append(
            jax.random.normal(keys[1 + i], (embedding_dim, embedding_dim),
                              jnp.float32) * 0.001)
        params["bs"].append(jnp.zeros((1, embedding_dim), jnp.float32))
    return params


def reference_forward(x, params, *, encoder_num_layers,
                      compute_dtype=jnp.float32):
    """Pure-JAX reference mirroring the PyTorch Sequential (training-mode BN).
    With compute_dtype=bfloat16 it mirrors the kernel's precision contract
    (bf16 MXU inputs, f32 accumulation, f32 BN/ReLU)."""
    cd = compute_dtype
    h = jnp.dot(x.astype(cd), params["w0"].T.astype(cd),
                preferred_element_type=jnp.float32) + params["b0"].reshape(1, -1)
    for i in range(encoder_num_layers - 1):
        mean = jnp.mean(h, axis=0, keepdims=True)
        mean_sq = jnp.mean(h * h, axis=0, keepdims=True)
        var = jnp.maximum(mean_sq - mean * mean, 0.0)
        inv_std = jax.lax.rsqrt(var + BN_EPS)
        scale = inv_std * params["gammas"][i].reshape(1, -1)
        shift = params["betas"][i].reshape(1, -1) - mean * scale
        h = jnp.maximum(h * scale + shift, 0.0)
        h = jnp.dot(h.astype(cd), params["ws"][i].T.astype(cd),
                    preferred_element_type=jnp.float32) + params["bs"][i].reshape(1, -1)
    return h


if __name__ == "__main__":
    # Logical shapes stay small (16 -> 32 features); batch fills MXU rows and is
    # the full BN-statistics batch.  Feature dims are lane-padded to 128 inside
    # prepare_params / the wrapper.
    batch = 256
    input_size = 16
    embedding_dim = 32
    encoder_num_layers = 3

    key = jax.random.PRNGKey(0)
    k_x, k_p = jax.random.split(key)
    x = jax.random.normal(k_x, (batch, input_size), jnp.float32)
    params = init_params(k_p, input_size, embedding_dim, encoder_num_layers)

    # One-time parameter prep (padding / transpose / bf16 cast hoisted out of
    # the per-call path), then a jitted forward.
    prepared = prepare_params(params)
    fwd = jax.jit(tabular_encoder_forward, static_argnames=("embedding_dim",))

    out = fwd(x, prepared, embedding_dim=embedding_dim)
    out = jax.block_until_ready(out)
    assert out.shape == (batch, embedding_dim)

    # Matched mixed-precision reference (same bf16 MXU inputs, f32 accumulation).
    ref_bf16 = reference_forward(x, params, encoder_num_layers=encoder_num_layers,
                                 compute_dtype=jnp.bfloat16)
    assert jnp.allclose(out, ref_bf16, rtol=1e-2, atol=1e-5), \
        "mismatch vs matched (bf16 matmul) reference"

    # Full-f32 PyTorch-semantics reference; loose tolerance covers bf16 MXU inputs.
    ref_f32 = reference_forward(x, params, encoder_num_layers=encoder_num_layers,
                                compute_dtype=jnp.float32)
    assert jnp.allclose(out, ref_f32, rtol=1e-1, atol=1e-3), \
        "mismatch vs f32 reference"

    print("KERNEL_OK")
</pallas_src>

<mosaic_0001>
module attributes {stable_mosaic.version = 11 : i64} {
  func.func @_encoder_kernel(%arg0: i32, %arg1: memref<256x128xbf16, #tpu.memory_space<vmem>>, %arg2: memref<128x128xbf16, #tpu.memory_space<vmem>>, %arg3: memref<1x128xf32, #tpu.memory_space<vmem>>, %arg4: memref<1x1x128xf32, #tpu.memory_space<vmem>>, %arg5: memref<1x1x128xf32, #tpu.memory_space<vmem>>, %arg6: memref<1x128x128xbf16, #tpu.memory_space<vmem>>, %arg7: memref<1x1x128xf32, #tpu.memory_space<vmem>>, %arg8: memref<256x128xf32, #tpu.memory_space<vmem>>, %arg9: memref<256x128xf32, #tpu.memory_space<vmem>>) attributes {dimension_semantics = [#tpu.dimension_semantics<arbitrary>], iteration_bounds = array<i64: 2>, scalar_prefetch = 0 : i64, scratch_operands = 1 : i64, tpu.core_type = #tpu.core_type<tc>, window_params = [{pipeline_mode = #tpu.pipeline_mode<synchronous>, transform_indices = @transform_0, window_bounds = array<i64: 256, 128>}, {pipeline_mode = #tpu.pipeline_mode<synchronous>, transform_indices = @transform_1, window_bounds = array<i64: 128, 128>}, {pipeline_mode = #tpu.pipeline_mode<synchronous>, transform_indices = @transform_2, window_bounds = array<i64: 1, 128>}, {transform_indices = @transform_3, window_bounds = array<i64: 1, 1, 128>}, {transform_indices = @transform_4, window_bounds = array<i64: 1, 1, 128>}, {transform_indices = @transform_5, window_bounds = array<i64: 1, 128, 128>}, {transform_indices = @transform_6, window_bounds = array<i64: 1, 1, 128>}, {pipeline_mode = #tpu.pipeline_mode<synchronous>, transform_indices = @transform_7, window_bounds = array<i64: 256, 128>}]} {
    %c0_i32 = arith.constant 0 : i32
    %0 = arith.cmpi eq, %arg0, %c0_i32 : i32
    %1 = arith.extui %0 : i1 to i32
    %c0_i32_0 = arith.constant 0 : i32
    %2 = arith.cmpi ne, %1, %c0_i32_0 : i32
    scf.if %2 {
      %c0_24 = arith.constant 0 : index
      %c0_25 = arith.constant 0 : index
      %45 = vector.load %arg1[%c0_24, %c0_25] : memref<256x128xbf16, #tpu.memory_space<vmem>>, vector<256x128xbf16>
      %c0_26 = arith.constant 0 : index
      %c0_27 = arith.constant 0 : index
      %46 = vector.load %arg2[%c0_26, %c0_27] : memref<128x128xbf16, #tpu.memory_space<vmem>>, vector<128x128xbf16>
      %cst_28 = arith.constant dense<0.000000e+00> : vector<256x128xf32>
      %47 = tpu.matmul %45, %46, %cst_28 {dimension_numbers = #tpu.dot_dimension_numbers<[1], [0], [0], [1], [0, 0, 1, 1], [], []>} : vector<256x128xbf16>, vector<128x128xbf16>, vector<256x128xf32> -> vector<256x128xf32>
      %c0_29 = arith.constant 0 : index
      %c0_30 = arith.constant 0 : index
      %48 = vector.load %arg3[%c0_29, %c0_30] : memref<1x128xf32, #tpu.memory_space<vmem>>, vector<1x128xf32>
      %49 = vector.broadcast %48 : vector<1x128xf32> to vector<256x128xf32>
      %50 = arith.addf %47, %49 : vector<256x128xf32>
      %c0_31 = arith.constant 0 : index
      %c0_32 = arith.constant 0 : index
      %51 = vector.load %arg9[%c0_31, %c0_32] : memref<256x128xf32, #tpu.memory_space<vmem>>, vector<256x128xf32>
      tpu.vector_store %arg9[%c0_31, %c0_32], %50 {strides = array<i32>} : memref<256x128xf32, #tpu.memory_space<vmem>>, vector<256x128xf32>,
    } else {
    }
    %c0 = arith.constant 0 : index
    %c0_1 = arith.constant 0 : index
    %3 = vector.load %arg9[%c0, %c0_1] : memref<256x128xf32, #tpu.memory_space<vmem>>, vector<256x128xf32>
    %cst = arith.constant dense<0.000000e+00> : vector<128xf32>
    %4 = vector.multi_reduction <add>, %3, %cst [0] : vector<256x128xf32> to vector<128xf32>
    %5 = vector.shape_cast %4 : vector<128xf32> to vector<1x128xf32>
    %cst_2 = arith.constant 2.560000e+02 : f32
    %6 = vector.broadcast %cst_2 : f32 to vector<1x128xf32>
    %7 = arith.divf %5, %6 : vector<1x128xf32>
    %8 = arith.mulf %3, %3 : vector<256x128xf32>
    %cst_3 = arith.constant dense<0.000000e+00> : vector<128xf32>
    %9 = vector.multi_reduction <add>, %8, %cst_3 [0] : vector<256x128xf32> to vector<128xf32>
    %10 = vector.shape_cast %9 : vector<128xf32> to vector<1x128xf32>
    %cst_4 = arith.constant 2.560000e+02 : f32
    %11 = vector.broadcast %cst_4 : f32 to vector<1x128xf32>
    %12 = arith.divf %10, %11 : vector<1x128xf32>
    %13 = arith.mulf %7, %7 : vector<1x128xf32>
    %14 = arith.subf %12, %13 : vector<1x128xf32>
    %cst_5 = arith.constant 0.000000e+00 : f32
    %15 = vector.broadcast %cst_5 : f32 to vector<1x128xf32>
    %16 = arith.maximumf %14, %15 : vector<1x128xf32>
    %cst_6 = arith.constant 9.99999974E-6 : f32
    %17 = vector.broadcast %cst_6 : f32 to vector<1x128xf32>
    %18 = arith.addf %16, %17 : vector<1x128xf32>
    %19 = math.rsqrt %18 : vector<1x128xf32>
    %c0_7 = arith.constant 0 : index
    %c0_8 = arith.constant 0 : index
    %c0_9 = arith.constant 0 : index
    %20 = vector.load %arg4[%c0_7, %c0_8, %c0_9] : memref<1x1x128xf32, #tpu.memory_space<vmem>>, vector<1x1x128xf32>
    %21 = vector.shape_cast %20 : vector<1x1x128xf32> to vector<1x128xf32>
    %22 = arith.mulf %19, %21 : vector<1x128xf32>
    %c0_10 = arith.constant 0 : index
    %c0_11 = arith.constant 0 : index
    %c0_12 = arith.constant 0 : index
    %23 = vector.load %arg5[%c0_10, %c0_11, %c0_12] : memref<1x1x128xf32, #tpu.memory_space<vmem>>, vector<1x1x128xf32>
    %24 = vector.shape_cast %23 : vector<1x1x128xf32> to vector<1x128xf32>
    %25 = arith.mulf %7, %22 : vector<1x128xf32>
    %26 = arith.subf %24, %25 : vector<1x128xf32>
    %27 = vector.broadcast %22 : vector<1x128xf32> to vector<256x128xf32>
    %28 = arith.mulf %3, %27 : vector<256x128xf32>
    %29 = vector.broadcast %26 : vector<1x128xf32> to vector<256x128xf32>
    %30 = arith.addf %28, %29 : vector<256x128xf32>
    %cst_13 = arith.constant 0.000000e+00 : f32
    %31 = vector.broadcast %cst_13 : f32 to vector<256x128xf32>
    %32 = arith.maximumf %30, %31 : vector<256x128xf32>
    %33 = arith.truncf %32 : vector<256x128xf32> to vector<256x128xbf16>
    %c0_14 = arith.constant 0 : index
    %c0_15 = arith.constant 0 : index
    %c0_16 = arith.constant 0 : index
    %34 = vector.load %arg6[%c0_14, %c0_15, %c0_16] : memref<1x128x128xbf16, #tpu.memory_space<vmem>>, vector<1x128x128xbf16>
    %35 = vector.shape_cast %34 : vector<1x128x128xbf16> to vector<128x128xbf16>
    %cst_17 = arith.constant dense<0.000000e+00> : vector<256x128xf32>
    %36 = tpu.matmul %33, %35, %cst_17 {dimension_numbers = #tpu.dot_dimension_numbers<[1], [0], [0], [1], [0, 0, 1, 1], [], []>} : vector<256x128xbf16>, vector<128x128xbf16>, vector<256x128xf32> -> vector<256x128xf32>
    %c0_18 = arith.constant 0 : index
    %c0_19 = arith.constant 0 : index
    %c0_20 = arith.constant 0 : index
    %37 = vector.load %arg7[%c0_18, %c0_19, %c0_20] : memref<1x1x128xf32, #tpu.memory_space<vmem>>, vector<1x1x128xf32>
    %38 = vector.shape_cast %37 : vector<1x1x128xf32> to vector<1x128xf32>
    %39 = vector.broadcast %38 : vector<1x128xf32> to vector<256x128xf32>
    %40 = arith.addf %36, %39 : vector<256x128xf32>
    %c0_21 = arith.constant 0 : index
    %c0_22 = arith.constant 0 : index
    %41 = vector.load %arg9[%c0_21, %c0_22] : memref<256x128xf32, #tpu.memory_space<vmem>>, vector<256x128xf32>
    tpu.vector_store %arg9[%c0_21, %c0_22], %40 {strides = array<i32>} : memref<256x128xf32, #tpu.memory_space<vmem>>, vector<256x128xf32>,
    %c1_i32 = arith.constant 1 : i32
    %42 = arith.cmpi eq, %arg0, %c1_i32 : i32
    %43 = arith.extui %42 : i1 to i32
    %c0_i32_23 = arith.constant 0 : i32
    %44 = arith.cmpi ne, %43, %c0_i32_23 : i32
    scf.if %44 {
      %c0_24 = arith.constant 0 : index
      %c0_25 = arith.constant 0 : index
      %45 = vector.load %arg8[%c0_24, %c0_25] : memref<256x128xf32, #tpu.memory_space<vmem>>, vector<256x128xf32>
      tpu.vector_store %arg8[%c0_24, %c0_25], %40 {strides = array<i32>} : memref<256x128xf32, #tpu.memory_space<vmem>>, vector<256x128xf32>,
    } else {
    }
    return
  }
  func.func @transform_0(%arg0: i32) -> (i32, i32) {
    %c0_i32 = arith.constant 0 : i32
    %c0_i32_0 = arith.constant 0 : i32
    %c0_i32_1 = arith.constant 0 : i32
    return %c0_i32, %c0_i32_0 : i32, i32
  }
  func.func @transform_1(%arg0: i32) -> (i32, i32) {
    %c0_i32 = arith.constant 0 : i32
    %c0_i32_0 = arith.constant 0 : i32
    %c0_i32_1 = arith.constant 0 : i32
    return %c0_i32, %c0_i32_0 : i32, i32
  }
  func.func @transform_2(%arg0: i32) -> (i32, i32) {
    %c0_i32 = arith.constant 0 : i32
    %c0_i32_0 = arith.constant 0 : i32
    %c0_i32_1 = arith.constant 0 : i32
    return %c0_i32, %c0_i32_0 : i32, i32
  }
  func.func @transform_3(%arg0: i32) -> (i32, i32, i32) {
    %c0_i32 = arith.constant 0 : i32
    %c0_i32_0 = arith.constant 0 : i32
    %c0_i32_1 = arith.constant 0 : i32
    return %arg0, %c0_i32, %c0_i32_0 : i32, i32, i32
  }
  func.func @transform_4(%arg0: i32) -> (i32, i32, i32) {
    %c0_i32 = arith.constant 0 : i32
    %c0_i32_0 = arith.constant 0 : i32
    %c0_i32_1 = arith.constant 0 : i32
    return %arg0, %c0_i32, %c0_i32_0 : i32, i32, i32
  }
  func.func @transform_5(%arg0: i32) -> (i32, i32, i32) {
    %c0_i32 = arith.constant 0 : i32
    %c0_i32_0 = arith.constant 0 : i32
    %c0_i32_1 = arith.constant 0 : i32
    return %arg0, %c0_i32, %c0_i32_0 : i32, i32, i32
  }
  func.func @transform_6(%arg0: i32) -> (i32, i32, i32) {
    %c0_i32 = arith.constant 0 : i32
    %c0_i32_0 = arith.constant 0 : i32
    %c0_i32_1 = arith.constant 0 : i32
    return %arg0, %c0_i32, %c0_i32_0 : i32, i32, i32
  }
  func.func @transform_7(%arg0: i32) -> (i32, i32) {
    %c0_i32 = arith.constant 0 : i32
    %c0_i32_0 = arith.constant 0 : i32
    %c0_i32_1 = arith.constant 0 : i32
    return %c0_i32, %c0_i32_0 : i32, i32
  }
}

</mosaic_0001>

<bundles_post_ra>
// kernel: tabular_encoder_forward.1
= control target key start
LH: loop header
LB: loop body
LE: loop exit
PB: predicated region body
PF: predicated region fallthrough
CT: control target
= control target key end

     0   :  { %s1642_s24 = smov 0   ;;  %s2273_s0 = inlined_call_operand.vmem [shape: bf16[256,128], index: 0, kind: input, shape index: {}]   ;;  %s2274_s1 = inlined_call_operand.vmem [shape: bf16[128,128], index: 1, kind: input, shape index: {}]   ;;  %s2275_s2 = inlined_call_operand.vmem [shape: f32[1,128], index: 2, kind: input, shape index: {}]   ;;  %s2276_s3 = inlined_call_operand.vmem [shape: f32[2,1,128], index: 3, kind: input, shape index: {}]   ;;  %s2277_s4 = inlined_call_operand.vmem [shape: f32[2,1,128], index: 4, kind: input, shape index: {}]   ;;  %s2278_s5 = inlined_call_operand.vmem [shape: bf16[2,128,128], index: 5, kind: input, shape index: {}]   ;;  %s2279_s6 = inlined_call_operand.vmem [shape: f32[2,1,128], index: 6, kind: input, shape index: {}]   ;;  %s2280_s7 = inlined_call_operand.vmem [shape: f32[256,128], index: 7, kind: output, shape index: {}]  }
   0x1 LB: > { %s1648_s25 = sadd.s32 4294967295, %s1600_s24   ;;  %p1334_p0 = scmp.ge.s32.totalorder %s1600_s24, 1  ;;  %s1600_s24 = sphi %s1642_s24, %s17_s24  }
   0x2   : > { %p256_p1 = scmp.lt.s32.totalorder %s1600_s24, 3 }
   0x4   : > { %p257_p2 = pnand %p1334_p0, %p256_p1 }
   0x5   : > { %p292_p3 = scmp.lt.s32.totalorder (!%p257_p2), %s1648_s25, 1  ;;  %p1337_p4 = scmp.ne.s32.totalorder (!%p257_p2), %s1648_s25, 0 }
   0x6   : > { %260 = sbr.rel (%p257_p2) target bundleno = 647 (0x287), region = 48 }
   0xd   : > { %s1654_s26 = scalar_select %p292_p3, %s1648_s25, 1 }
   0xe   : > { %310 = sbr.rel (%p1337_p4) target bundleno = 289 (0x121), region = 52  ;;  %v1560_v0 = vld [vmem:[%s2274_s1] sm:$0xff] (!%p1337_p4)   ;;  %v1561_v1 = vld [vmem:[%s2274_s1 + $0x8] sm:$0xff] (!%p1337_p4)   ;;  %v1562_v2 = vld [vmem:[%s2274_s1 + $0x10] sm:$0xff] (!%p1337_p4)  }
   0xf   : > { %s294_s29 = scalar_lea.vmem %s2276_s3, %s1654_s26  ;;  %s297_s9 = scalar_lea.vmem %s2277_s4, %s1654_s26  ;;  %1424 = vmatprep.subr.bf16.mxu0 (!%p1337_p4), %v1560_v0  ;;  %1520 = vmatprep.subr.bf16.mxu1 (!%p1337_p4), %v1560_v0  ;;  %v1563_v3 = vld [vmem:[%s2274_s1 + $0x18] sm:$0xff] (!%p1337_p4)   ;;  %v1568_v4 = vld [vmem:[%s2273_s0] sm:$0xff] (!%p1337_p4)   ;;  %v1565_v7 = vld [vmem:[%s2274_s1 + $0x28] sm:$0xff] (!%p1337_p4)  }
  0x10   : > { %s1375_s10 = sshll.u32 %s1654_s26, 6  ;;  %s305_s13 = scalar_lea.vmem %s2279_s6, %s1654_s26  ;;  %1425 = vmatpush3.bf16.msra.mxu0 (!%p1337_p4), %v1560_v0  ;;  %1528 = vmatpush3.bf16.msra.mxu1 (!%p1337_p4), %v1560_v0  ;;  %v1569_v5 = vld [vmem:[%s2273_s0 + $0x40] sm:$0xff] (!%p1337_p4)   ;;  %v1566_v8 = vld [vmem:[%s2274_s1 + $0x30] sm:$0xff] (!%p1337_p4)   ;;  %v1567_v9 = vld [vmem:[%s2274_s1 + $0x38] sm:$0xff] (!%p1337_p4)  }
  0x11   : > { %s1672_s16 = scalar_lea.vmem %s2278_s5, %s1375_s10  ;;  %1426 = vmatprep.subr.bf16.mxu0 (!%p1337_p4), %v1561_v1  ;;  %1521 = vmatprep.subr.bf16.mxu1 (!%p1337_p4), %v1561_v1  ;;  %v1564_v6 = vld [vmem:[%s2274_s1 + $0x20] sm:$0xff] (!%p1337_p4)   ;;  %v1570_v10 = vld [vmem:[%s2273_s0 + $0x8] sm:$0xff] (!%p1337_p4)   ;;  %v1572_v12 = vld [vmem:[%s2273_s0 + $0x10] sm:$0xff] (!%p1337_p4)  }
  0x12   : > { %1440 = vmatprep.mubr.bf16.mxu0 (!%p1337_p4), %v1568_v4  ;;  %1456 = vmatprep.mubr.bf16.mxu1 (!%p1337_p4), %v1569_v5  ;;  %v1571_v11 = vld [vmem:[%s2273_s0 + $0x48] sm:$0xff] (!%p1337_p4)   ;;  %v1573_v13 = vld [vmem:[%s2273_s0 + $0x50] sm:$0xff] (!%p1337_p4)   ;;  %v1574_v14 = vld [vmem:[%s2273_s0 + $0x18] sm:$0xff] (!%p1337_p4)  }
  0x13   : > { %v1575_v15 = vld [vmem:[%s2273_s0 + $0x58] sm:$0xff] (!%p1337_p4)   ;;  %v1576_v16 = vld [vmem:[%s2273_s0 + $0x20] sm:$0xff] (!%p1337_p4)   ;;  %v1578_v18 = vld [vmem:[%s2273_s0 + $0x28] sm:$0xff] (!%p1337_p4)  }
  0x14   : > { %1427 = vmatpush3.bf16.msra.mxu0 (!%p1337_p4), %v1561_v1  ;;  %1529 = vmatpush3.bf16.msra.mxu1 (!%p1337_p4), %v1561_v1  ;;  %v1577_v17 = vld [vmem:[%s2273_s0 + $0x60] sm:$0xff] (!%p1337_p4)   ;;  %v1579_v19 = vld [vmem:[%s2273_s0 + $0x68] sm:$0xff] (!%p1337_p4)   ;;  %v1580_v20 = vld [vmem:[%s2273_s0 + $0x30] sm:$0xff] (!%p1337_p4)  }
  0x15   : > { %1428 = vmatprep.subr.bf16.mxu0 %v1562_v2  ;;  %1522 = vmatprep.subr.bf16.mxu1 %v1562_v2  ;;  %v1581_v21 = vld [vmem:[%s2273_s0 + $0x70] sm:$0xff]   ;;  %v1582_v22 = vld [vmem:[%s2273_s0 + $0x38] sm:$0xff]   ;;  %v1750_v24 = vld [vmem:[%s2275_s2] ss:$0 sm:$0xff] }
  0x16   : > { %v1583_v23 = vld [vmem:[%s2273_s0 + $0x78] sm:$0xff]  }
  0x18   : > { %1429 = vmatpush3.bf16.msra.mxu0 %v1562_v2  ;;  %1530 = vmatpush3.bf16.msra.mxu1 %v1562_v2 }
  0x19   : > { %1430 = vmatprep.subr.bf16.mxu0 %v1563_v3  ;;  %1523 = vmatprep.subr.bf16.mxu1 %v1563_v3 }
  0x1c   : > { %1431 = vmatpush3.bf16.msra.mxu0 %v1563_v3  ;;  %1531 = vmatpush3.bf16.msra.mxu1 %v1563_v3 }
  0x1d   : > { %1432 = vmatprep.subr.bf16.mxu0 %v1564_v6  ;;  %1524 = vmatprep.subr.bf16.mxu1 %v1564_v6 }
  0x20   : > { %1433 = vmatpush3.bf16.msra.mxu0 %v1564_v6  ;;  %1532 = vmatpush3.bf16.msra.mxu1 %v1564_v6 }
  0x21   : > { %1434 = vmatprep.subr.bf16.mxu0 %v1565_v7  ;;  %1525 = vmatprep.subr.bf16.mxu1 %v1565_v7 }
  0x24   : > { %1435 = vmatpush3.bf16.msra.mxu0 %v1565_v7  ;;  %1533 = vmatpush3.bf16.msra.mxu1 %v1565_v7 }
  0x25   : > { %1436 = vmatprep.subr.bf16.mxu0 %v1566_v8  ;;  %1526 = vmatprep.subr.bf16.mxu1 %v1566_v8 }
  0x28   : > { %1437 = vmatpush3.bf16.msra.mxu0 %v1566_v8  ;;  %1534 = vmatpush3.bf16.msra.mxu1 %v1566_v8 }
  0x29   : > { %1438 = vmatprep.subr.bf16.mxu0 %v1567_v9  ;;  %1527 = vmatprep.subr.bf16.mxu1 %v1567_v9 }
  0x2c   : > { %1439 = vmatpush3.bf16.msra.mxu0 %v1567_v9  ;;  %1535 = vmatpush3.bf16.msra.mxu1 %v1567_v9 }
  0x2f   : > { %1441 = vmatmul.mubr.bf16.vlgmr.msra.gmra.mrb[0].mxu0 %v1570_v10  ;;  %1457 = vmatmul.mubr.bf16.vlgmr.msra.gmra.mrb[0].mxu1 %v1571_v11 }
  0x30   : > { %1444 = vmatprep.mubr.bf16.mxu0 %v1572_v12  ;;  %1460 = vmatprep.mubr.bf16.mxu1 %v1573_v13 }
  0x37   : > { %1445 = vmatmul.mubr.bf16.gmra.mrb[4].mxu0 %v1574_v14  ;;  %1461 = vmatmul.mubr.bf16.gmra.mrb[4].mxu1 %v1575_v15 }
  0x38   : > { %1448 = vmatprep.mubr.bf16.mxu0 %v1576_v16  ;;  %1464 = vmatprep.mubr.bf16.mxu1 %v1577_v17 }
  0x3f   : > { %1449 = vmatmul.mubr.bf16.gmra.mrb[8].mxu0 %v1578_v18  ;;  %1465 = vmatmul.mubr.bf16.gmra.mrb[8].mxu1 %v1579_v19 }
  0x40   : > { %1452 = vmatprep.mubr.bf16.mxu0 %v1580_v20  ;;  %1468 = vmatprep.mubr.bf16.mxu1 %v1581_v21 }
  0x47   : > { %1453 = vmatmul.mubr.bf16.gmra.mrb[12].mxu0 %v1582_v22  ;;  %1469 = vmatmul.mubr.bf16.gmra.mrb[12].mxu1 %v1583_v23 }
 0x102   : > { %v1442_v25 = vpop.f32.mrb[0].mxu0  ;;  %v1458_v26 = vpop.f32.mrb[0].mxu1 }
 0x103   : > { %v553_v27 = vadd.f32 %v1442_v25, %v1750_v24  ;;  %v617_v28 = vadd.f32 %v1458_v26, %v1750_v24  ;;  %v544_v29 = vpop.f32.mrb[1].mxu0  ;;  %v608_v30 = vpop.f32.mrb[1].mxu1 }
 0x104   : > { %v545_v31 = vadd.f32 %v1750_v24, %v544_v29  ;;  %v609_v32 = vadd.f32 %v1750_v24, %v608_v30  ;;  %v1443_v33 = vpop.f32.mrb[2].mxu0  ;;  %v1459_v34 = vpop.f32.mrb[2].mxu1 }
 0x105   : > { %673 = vst [vmem:[#allocation2 + $0x10] sm:$0xff] %v553_v27  ;;  %689 = vst [vmem:[#allocation2 + $0x90] sm:$0xff] %v617_v28  ;;  %v556_v35 = vadd.f32 %v1443_v33, %v1750_v24  ;;  %v620_v36 = vadd.f32 %v1459_v34, %v1750_v24  ;;  %v547_v37 = vpop.f32.mrb[3].mxu0  ;;  %v611_v38 = vpop.f32.mrb[3].mxu1 }
 0x106   : > { %671 = vst [vmem:[#allocation2] sm:$0xff] %v545_v31  ;;  %687 = vst [vmem:[#allocation2 + $0x80] sm:$0xff] %v609_v32  ;;  %v548_v39 = vadd.f32 %v1750_v24, %v547_v37  ;;  %v612_v40 = vadd.f32 %v1750_v24, %v611_v38 }
 0x107   : > { %674 = vst [vmem:[#allocation2 + $0x18] sm:$0xff] %v556_v35  ;;  %690 = vst [vmem:[#allocation2 + $0x98] sm:$0xff] %v620_v36 }
 0x108   : > { %672 = vst [vmem:[#allocation2 + $0x8] sm:$0xff] %v548_v39  ;;  %688 = vst [vmem:[#allocation2 + $0x88] sm:$0xff] %v612_v40 }
 0x10a   : > { %v1446_v41 = vpop.f32.mrb[4].mxu0  ;;  %v1462_v42 = vpop.f32.mrb[4].mxu1 }
 0x10b   : > { %v569_v43 = vadd.f32 %v1446_v41, %v1750_v24  ;;  %v633_v44 = vadd.f32 %v1462_v42, %v1750_v24  ;;  %v560_v45 = vpop.f32.mrb[5].mxu0  ;;  %v624_v46 = vpop.f32.mrb[5].mxu1 }
 0x10c   : > { %v561_v47 = vadd.f32 %v1750_v24, %v560_v45  ;;  %v625_v48 = vadd.f32 %v1750_v24, %v624_v46  ;;  %v1447_v49 = vpop.f32.mrb[6].mxu0  ;;  %v1463_v50 = vpop.f32.mrb[6].mxu1 }
 0x10d   : > { %677 = vst [vmem:[#allocation2 + $0x30] sm:$0xff] %v569_v43  ;;  %693 = vst [vmem:[#allocation2 + $0xb0] sm:$0xff] %v633_v44  ;;  %v572_v51 = vadd.f32 %v1447_v49, %v1750_v24  ;;  %v636_v52 = vadd.f32 %v1463_v50, %v1750_v24  ;;  %v563_v53 = vpop.f32.mrb[7].mxu0  ;;  %v627_v54 = vpop.f32.mrb[7].mxu1 }
 0x10e   : > { %675 = vst [vmem:[#allocation2 + $0x20] sm:$0xff] %v561_v47  ;;  %691 = vst [vmem:[#allocation2 + $0xa0] sm:$0xff] %v625_v48  ;;  %v564_v55 = vadd.f32 %v1750_v24, %v563_v53  ;;  %v628_v56 = vadd.f32 %v1750_v24, %v627_v54 }
 0x10f   : > { %678 = vst [vmem:[#allocation2 + $0x38] sm:$0xff] %v572_v51  ;;  %694 = vst [vmem:[#allocation2 + $0xb8] sm:$0xff] %v636_v52 }
 0x110   : > { %676 = vst [vmem:[#allocation2 + $0x28] sm:$0xff] %v564_v55  ;;  %692 = vst [vmem:[#allocation2 + $0xa8] sm:$0xff] %v628_v56 }
 0x112   : > { %v1450_v57 = vpop.f32.mrb[8].mxu0  ;;  %v1466_v58 = vpop.f32.mrb[8].mxu1 }
 0x113   : > { %v585_v59 = vadd.f32 %v1450_v57, %v1750_v24  ;;  %v649_v60 = vadd.f32 %v1466_v58, %v1750_v24  ;;  %v576_v61 = vpop.f32.mrb[9].mxu0  ;;  %v640_v62 = vpop.f32.mrb[9].mxu1 }
 0x114   : > { %v577_v63 = vadd.f32 %v1750_v24, %v576_v61  ;;  %v641_v0 = vadd.f32 %v1750_v24, %v640_v62  ;;  %v1451_v1 = vpop.f32.mrb[10].mxu0  ;;  %v1467_v2 = vpop.f32.mrb[10].mxu1 }
 0x115   : > { %681 = vst [vmem:[#allocation2 + $0x50] sm:$0xff] %v585_v59  ;;  %697 = vst [vmem:[#allocation2 + $0xd0] sm:$0xff] %v649_v60  ;;  %v588_v3 = vadd.f32 %v1451_v1, %v1750_v24  ;;  %v652_v4 = vadd.f32 %v1467_v2, %v1750_v24  ;;  %v579_v5 = vpop.f32.mrb[11].mxu0  ;;  %v643_v6 = vpop.f32.mrb[11].mxu1 }
 0x116   : > { %679 = vst [vmem:[#allocation2 + $0x40] sm:$0xff] %v577_v63  ;;  %695 = vst [vmem:[#allocation2 + $0xc0] sm:$0xff] %v641_v0  ;;  %v580_v7 = vadd.f32 %v1750_v24, %v579_v5  ;;  %v644_v8 = vadd.f32 %v1750_v24, %v643_v6 }
 0x117   : > { %682 = vst [vmem:[#allocation2 + $0x58] sm:$0xff] %v588_v3  ;;  %698 = vst [vmem:[#allocation2 + $0xd8] sm:$0xff] %v652_v4 }
 0x118   : > { %680 = vst [vmem:[#allocation2 + $0x48] sm:$0xff] %v580_v7  ;;  %696 = vst [vmem:[#allocation2 + $0xc8] sm:$0xff] %v644_v8 }
 0x11a   : > { %v1454_v9 = vpop.f32.mrb[12].mxu0  ;;  %v1470_v10 = vpop.f32.mrb[12].mxu1 }
 0x11b   : > { %v601_v11 = vadd.f32 %v1454_v9, %v1750_v24  ;;  %v665_v12 = vadd.f32 %v1470_v10, %v1750_v24  ;;  %v592_v13 = vpop.f32.mrb[13].mxu0  ;;  %v656_v14 = vpop.f32.mrb[13].mxu1 }
 0x11c   : > { %v593_v15 = vadd.f32 %v1750_v24, %v592_v13  ;;  %v657_v16 = vadd.f32 %v1750_v24, %v656_v14  ;;  %v1455_v17 = vpop.f32.mrb[14].mxu0  ;;  %v1471_v18 = vpop.f32.mrb[14].mxu1 }
 0x11d   : > { %685 = vst [vmem:[#allocation2 + $0x70] sm:$0xff] %v601_v11  ;;  %701 = vst [vmem:[#allocation2 + $0xf0] sm:$0xff] %v665_v12  ;;  %v604_v19 = vadd.f32 %v1455_v17, %v1750_v24  ;;  %v668_v20 = vadd.f32 %v1471_v18, %v1750_v24  ;;  %v595_v21 = vpop.f32.mrb[15].mxu0  ;;  %v659_v22 = vpop.f32.mrb[15].mxu1 }
 0x11e   : > { %683 = vst [vmem:[#allocation2 + $0x60] sm:$0xff] %v593_v15  ;;  %699 = vst [vmem:[#allocation2 + $0xe0] sm:$0xff] %v657_v16  ;;  %v596_v23 = vadd.f32 %v1750_v24, %v595_v21  ;;  %v660_v25 = vadd.f32 %v1750_v24, %v659_v22 }
 0x11f   : > { %686 = vst [vmem:[#allocation2 + $0x78] sm:$0xff] %v604_v19  ;;  %702 = vst [vmem:[#allocation2 + $0xf8] sm:$0xff] %v668_v20 }
 0x120   : > { %684 = vst [vmem:[#allocation2 + $0x68] sm:$0xff] %v596_v23  ;;  %700 = vst [vmem:[#allocation2 + $0xe8] sm:$0xff] %v660_v25 }
 0x121 PF: > { %v1584_v26 = vld [vmem:[%s1672_s16] sm:$0xff]   ;;  %v1585_v27 = vld [vmem:[%s1672_s16 + $0x8] sm:$0xff]   ;;  %v1586_v28 = vld [vmem:[%s1672_s16 + $0x10] sm:$0xff]   ;;  %p1372_p5 = scmp.ne.s32.totalorder %s1648_s25, 1 }
 0x122   : > { %1472 = vmatprep.subr.bf16.mxu0 %v1584_v26  ;;  %1536 = vmatprep.subr.bf16.mxu1 %v1584_v26  ;;  %v1587_v24 = vld [vmem:[%s1672_s16 + $0x18] sm:$0xff]   ;;  %v1788_v29 = vld [vmem:[#allocation2] sm:$0xff]  ;;  %v1790_v30 = vld [vmem:[#allocation2 + $0x8] sm:$0xff] }
 0x123   : > { %1473 = vmatpush3.bf16.msra.mxu0 %v1584_v26  ;;  %1544 = vmatpush3.bf16.msra.mxu1 %v1584_v26  ;;  %v1792_v31 = vld [vmem:[#allocation2 + $0x10] sm:$0xff]  ;;  %v735_v32 = vadd.f32 %v1790_v30, %v1788_v29  ;;  %v1796_v33 = vld [vmem:[#allocation2 + $0x18] sm:$0xff]  ;;  %v1588_v35 = vld [vmem:[%s1672_s16 + $0x20] sm:$0xff]   ;;  %v774_v42 = vmul.f32 %v1788_v29, %v1788_v29  ;;  %v775_v43 = vmul.f32 %v1790_v30, %v1790_v30 }
 0x124   : > { %1474 = vmatprep.subr.bf16.mxu0 %v1585_v27  ;;  %1537 = vmatprep.subr.bf16.mxu1 %v1585_v27  ;;  %v1800_v36 = vld [vmem:[#allocation2 + $0x20] sm:$0xff]  ;;  %v1803_v38 = vld [vmem:[#allocation2 + $0x28] sm:$0xff]  ;;  %v1807_v41 = vld [vmem:[#allocation2 + $0x30] sm:$0xff]  ;;  %v776_v46 = vmul.f32 %v1792_v31, %v1792_v31  ;;  %v777_v50 = vmul.f32 %v1796_v33, %v1796_v33 }
 0x125   : > { %v736_v34 = vadd.f32 %v735_v32, %v1792_v31  ;;  %v1589_v40 = vld [vmem:[%s1672_s16 + $0x28] sm:$0xff]   ;;  %v1814_v45 = vld [vmem:[#allocation2 + $0x38] sm:$0xff]  ;;  %v1590_v48 = vld [vmem:[%s1672_s16 + $0x30] sm:$0xff]   ;;  %v806_v51 = vadd.f32 %v775_v43, %v774_v42  ;;  %v778_v54 = vmul.f32 %v1800_v36, %v1800_v36  ;;  %v779_v59 = vmul.f32 %v1803_v38, %v1803_v38 }
 0x126   : > { %v1820_v49 = vld [vmem:[#allocation2 + $0x40] sm:$0xff]  ;;  %v1825_v53 = vld [vmem:[#allocation2 + $0x48] sm:$0xff]  ;;  %v1591_v57 = vld [vmem:[%s1672_s16 + $0x38] sm:$0xff]   ;;  %v780_v63 = vmul.f32 %v1807_v41, %v1807_v41  ;;  %v781_v3 = vmul.f32 %v1814_v45, %v1814_v45 }
 0x127   : > { %1475 = vmatpush3.bf16.msra.mxu0 %v1585_v27  ;;  %1545 = vmatpush3.bf16.msra.mxu1 %v1585_v27  ;;  %v737_v37 = vadd.f32 %v736_v34, %v1796_v33  ;;  %v807_v55 = vadd.f32 %v806_v51, %v776_v46  ;;  %v1831_v58 = vld [vmem:[#allocation2 + $0x50] sm:$0xff]  ;;  %v1836_v62 = vld [vmem:[#allocation2 + $0x58] sm:$0xff]  ;;  %v1841_v2 = vld [vmem:[#allocation2 + $0x60] sm:$0xff]  ;;  %v782_v7 = vmul.f32 %v1820_v49, %v1820_v49 }
 0x128   : > { %1476 = vmatprep.subr.bf16.mxu0 %v1586_v28  ;;  %1538 = vmatprep.subr.bf16.mxu1 %v1586_v28  ;;  %v1846_v6 = vld [vmem:[#allocation2 + $0x68] sm:$0xff]  ;;  %v1851_v10 = vld [vmem:[#allocation2 + $0x70] sm:$0xff]  ;;  %v783_v11 = vmul.f32 %v1825_v53, %v1825_v53  ;;  %v1856_v14 = vld [vmem:[#allocation2 + $0x78] sm:$0xff]  ;;  %v784_v15 = vmul.f32 %v1831_v58, %v1831_v58  ;;  %v785_v19 = vmul.f32 %v1836_v62, %v1836_v62 }
 0x129   : > { %v738_v39 = vadd.f32 %v737_v37, %v1800_v36  ;;  %v808_v60 = vadd.f32 %v807_v55, %v777_v50  ;;  %v1861_v18 = vld [vmem:[#allocation2 + $0x80] sm:$0xff]  ;;  %v1866_v22 = vld [vmem:[#allocation2 + $0x88] sm:$0xff]  ;;  %v786_v23 = vmul.f32 %v1841_v2, %v1841_v2  ;;  %v1871_v27 = vld [vmem:[#allocation2 + $0x90] sm:$0xff]  ;;  %v789_v42 = vmul.f32 %v1856_v14, %v1856_v14 }
 0x12a   : > { %v1876_v34 = vld [vmem:[#allocation2 + $0x98] sm:$0xff]  ;;  %v1886_v46 = vld [vmem:[#allocation2 + $0xa8] sm:$0xff]  ;;  %v1891_v51 = vld [vmem:[#allocation2 + $0xb0] sm:$0xff] }
 0x12b   : > { %1477 = vmatpush3.bf16.msra.mxu0 %v1586_v28  ;;  %1546 = vmatpush3.bf16.msra.mxu1 %v1586_v28  ;;  %v739_v44 = vadd.f32 %v738_v39, %v1803_v38  ;;  %v809_v0 = vadd.f32 %v808_v60, %v778_v54  ;;  %v787_v28 = vmul.f32 %v1846_v6, %v1846_v6 }
 0x12c   : > { %1478 = vmatprep.subr.bf16.mxu0 %v1587_v24  ;;  %1539 = vmatprep.subr.bf16.mxu1 %v1587_v24 }
 0x12d   : > { %v740_v47 = vadd.f32 %v739_v44, %v1807_v41  ;;  %v810_v4 = vadd.f32 %v809_v0, %v779_v59 }
 0x12f   : > { %1479 = vmatpush3.bf16.msra.mxu0 %v1587_v24  ;;  %1547 = vmatpush3.bf16.msra.mxu1 %v1587_v24  ;;  %v741_v52 = vadd.f32 %v740_v47, %v1814_v45  ;;  %v811_v8 = vadd.f32 %v810_v4, %v780_v63  ;;  %v790_v47 = vmul.f32 %v1861_v18, %v1861_v18 }
 0x130   : > { %1480 = vmatprep.subr.bf16.mxu0 %v1588_v35  ;;  %1540 = vmatprep.subr.bf16.mxu1 %v1588_v35  ;;  %v793_v63 = vmul.f32 %v1876_v34, %v1876_v34 }
 0x131   : > { %v742_v56 = vadd.f32 %v741_v52, %v1820_v49  ;;  %v812_v12 = vadd.f32 %v811_v8, %v781_v3  ;;  %v791_v52 = vmul.f32 %v1866_v22, %v1866_v22  ;;  %v1906_v3 = vld [vmem:[#allocation2 + $0xc8] sm:$0xff]  ;;  %v1911_v8 = vld [vmem:[#allocation2 + $0xd0] sm:$0xff] }
 0x133   : > { %1481 = vmatpush3.bf16.msra.mxu0 %v1588_v35  ;;  %1548 = vmatpush3.bf16.msra.mxu1 %v1588_v35  ;;  %v743_v61 = vadd.f32 %v742_v56, %v1825_v53  ;;  %v813_v16 = vadd.f32 %v812_v12, %v782_v7  ;;  %v788_v35 = vmul.f32 %v1851_v10, %v1851_v10  ;;  %v1896_v56 = vld [vmem:[#allocation2 + $0xb8] sm:$0xff] }
 0x134   : > { %1482 = vmatprep.subr.bf16.mxu0 %v1589_v40  ;;  %1541 = vmatprep.subr.bf16.mxu1 %v1589_v40 }
 0x135   : > { %v744_v1 = vadd.f32 %v743_v61, %v1831_v58  ;;  %v814_v20 = vadd.f32 %v813_v16, %v783_v11  ;;  %v1901_v61 = vld [vmem:[#allocation2 + $0xc0] sm:$0xff] }
 0x137   : > { %1483 = vmatpush3.bf16.msra.mxu0 %v1589_v40  ;;  %1549 = vmatpush3.bf16.msra.mxu1 %v1589_v40  ;;  %v745_v5 = vadd.f32 %v744_v1, %v1836_v62  ;;  %v815_v25 = vadd.f32 %v814_v20, %v784_v15  ;;  %v1881_v40 = vld [vmem:[#allocation2 + $0xa0] sm:$0xff]  ;;  %v796_v15 = vmul.f32 %v1891_v51, %v1891_v51 }
 0x138   : > { %1484 = vmatprep.subr.bf16.mxu0 %v1590_v48  ;;  %1542 = vmatprep.subr.bf16.mxu1 %v1590_v48  ;;  %v794_v4 = vmul.f32 %v1881_v40, %v1881_v40  ;;  %v797_v20 = vmul.f32 %v1896_v56, %v1896_v56 }
 0x139   : > { %v746_v9 = vadd.f32 %v745_v5, %v1841_v2  ;;  %v816_v24 = vadd.f32 %v815_v25, %v785_v19  ;;  %v1921_v19 = vld [vmem:[#allocation2 + $0xe0] sm:$0xff]  ;;  %v1926_v25 = vld [vmem:[#allocation2 + $0xe8] sm:$0xff] }
 0x13b   : > { %1485 = vmatpush3.bf16.msra.mxu0 %v1590_v48  ;;  %1550 = vmatpush3.bf16.msra.mxu1 %v1590_v48  ;;  %v747_v13 = vadd.f32 %v746_v9, %v1846_v6  ;;  %v817_v37 = vadd.f32 %v816_v24, %v786_v23  ;;  %v795_v9 = vmul.f32 %v1886_v46, %v1886_v46 }
 0x13c   : > { %1486 = vmatprep.subr.bf16.mxu0 %v1591_v57  ;;  %1543 = vmatprep.subr.bf16.mxu1 %v1591_v57 }
 0x13d   : > { %v748_v17 = vadd.f32 %v747_v13, %v1851_v10  ;;  %v818_v43 = vadd.f32 %v817_v37, %v787_v28  ;;  %v1916_v13 = vld [vmem:[#allocation2 + $0xd8] sm:$0xff] }
 0x13f   : > { %1487 = vmatpush3.bf16.msra.mxu0 %v1591_v57  ;;  %1551 = vmatpush3.bf16.msra.mxu1 %v1591_v57  ;;  %v749_v21 = vadd.f32 %v748_v17, %v1856_v14  ;;  %v819_v48 = vadd.f32 %v818_v43, %v788_v35  ;;  %v792_v57 = vmul.f32 %v1871_v27, %v1871_v27 }
 0x140   : > { %v799_v35 = vmul.f32 %v1906_v3, %v1906_v3  ;;  %v800_v43 = vmul.f32 %v1911_v8, %v1911_v8 }
 0x141   : > { %v750_v26 = vadd.f32 %v749_v21, %v1861_v18  ;;  %v820_v54 = vadd.f32 %v819_v48, %v789_v42  ;;  %v1936_v42 = vld [vmem:[#allocation2 + $0xf8] sm:$0xff]  ;;  %v801_v48 = vmul.f32 %v1916_v13, %v1916_v13 }
 0x143   : > { %v751_v32 = vadd.f32 %v750_v26, %v1866_v22  ;;  %v821_v59 = vadd.f32 %v820_v54, %v790_v47  ;;  %v798_v26 = vmul.f32 %v1901_v61, %v1901_v61  ;;  %v802_v54 = vmul.f32 %v1921_v19, %v1921_v19 }
 0x145   : > { %v752_v39 = vadd.f32 %v751_v32, %v1871_v27  ;;  %v822_v0 = vadd.f32 %v821_v59, %v791_v52  ;;  %v1931_v32 = vld [vmem:[#allocation2 + $0xf0] sm:$0xff]  ;;  %v803_v59 = vmul.f32 %v1926_v25, %v1926_v25 }
 0x147   : > { %v753_v44 = vadd.f32 %v752_v39, %v1876_v34  ;;  %v823_v5 = vadd.f32 %v822_v0, %v792_v57  ;;  %v804_v0 = vmul.f32 %v1931_v32, %v1931_v32 }
 0x149   : > { %v754_v50 = vadd.f32 %v753_v44, %v1881_v40  ;;  %v824_v11 = vadd.f32 %v823_v5, %v793_v63  ;;  %v805_v5 = vmul.f32 %v1936_v42, %v1936_v42 }
 0x14b   : > { %v755_v55 = vadd.f32 %v754_v50, %v1886_v46  ;;  %v825_v16 = vadd.f32 %v824_v11, %v794_v4 }
 0x14d   : > { %v756_v60 = vadd.f32 %v755_v55, %v1891_v51  ;;  %v826_v21 = vadd.f32 %v825_v16, %v795_v9 }
 0x14f   : > { %v757_v1 = vadd.f32 %v756_v60, %v1896_v56  ;;  %v827_v28 = vadd.f32 %v826_v21, %v796_v15 }
 0x151   : > { %v758_v7 = vadd.f32 %v757_v1, %v1901_v61  ;;  %v828_v37 = vadd.f32 %v827_v28, %v797_v20 }
 0x153   : > { %v759_v12 = vadd.f32 %v758_v7, %v1906_v3  ;;  %v829_v44 = vadd.f32 %v828_v37, %v798_v26 }
 0x155   : > { %v760_v17 = vadd.f32 %v759_v12, %v1911_v8  ;;  %v830_v50 = vadd.f32 %v829_v44, %v799_v35 }
 0x157   : > { %v761_v23 = vadd.f32 %v760_v17, %v1916_v13  ;;  %v831_v55 = vadd.f32 %v830_v50, %v800_v43  ;;  %v849_v50 = vld [vmem:[%s294_s29] sm:$0x1] }
 0x159   : > { %v762_v24 = vadd.f32 %v761_v23, %v1921_v19  ;;  %v832_v60 = vadd.f32 %v831_v55, %v801_v48 }
 0x15b   : > { %v763_v39 = vadd.f32 %v762_v24, %v1926_v25  ;;  %v833_v1 = vadd.f32 %v832_v60, %v802_v54 }
 0x15d   : > { %v764_v47 = vadd.f32 %v763_v39, %v1931_v32  ;;  %v834_v7 = vadd.f32 %v833_v1, %v803_v59 }
 0x15f   : > { %v765_v52 = vadd.f32 %v764_v47, %v1936_v42  ;;  %v835_v11 = vadd.f32 %v834_v7, %v804_v0  ;;  %v854_v47 = vlaneseq }
 0x161   : > { %v766_v57 = vrot.slane %v765_v52, 4  ;;  %v836_v15 = vadd.f32 %v835_v11, %v805_v5  ;;  %v855_v48 = vshrl.u32 %v854_v47, 7 }
 0x163   : > { %v767_v63 = vadd.f32 %v766_v57, %v765_v52  ;;  %v837_v16 = vrot.slane %v836_v15, 4  ;;  %v856_v52 = vsub.s32 0, %v855_v48  ;;  %v851_v57 = vld [vmem:[%s297_s9] sm:$0x1] }
 0x165   : > { %v768_v4 = vrot.slane %v767_v63, 2  ;;  %v838_v20 = vadd.f32 %v837_v16, %v836_v15 }
 0x167   : > { %v769_v9 = vadd.f32 %v768_v4, %v767_v63  ;;  %v839_v21 = vrot.slane %v838_v20, 2 }
 0x169   : > { %v770_v12 = vrot.slane %v769_v9, 1  ;;  %v840_v26 = vadd.f32 %v839_v21, %v838_v20 }
 0x16b   : > { %v771_v17 = vadd.f32 %v770_v12, %v769_v9  ;;  %v841_v28 = vrot.slane %v840_v26, 1 }
 0x16d   : > { %v773_v23 = vmul.f32 0.00390625, %v771_v17  ;;  %v842_v24 = vadd.f32 %v841_v28, %v840_v26 }
 0x16f   : > { %v844_v35 = vmul.f32 %v773_v23, %v773_v23  ;;  %v843_v37 = vmul.f32 0.00390625, %v842_v24 }
 0x171   : > { %v845_v39 = vsub.f32 %v843_v37, %v844_v35 }
 0x173   : > { %v846_v43 = vmax.f32 %v845_v39, 0.0 }
 0x175   : > { %v847_v44 = vadd.f32 1e-05, %v846_v43 }
 0x177   : > { %1592 = vrsqrt.f32 %v847_v44 }
 0x181   : > { %v1593_v54 = vpop.eup %1592 }
 0x182   : > { %v850_v55 = vmul.f32 %v1593_v54, %v849_v50 }
 0x184   : > { %v852_v59 = vmul.f32 %v850_v55, %v773_v23  ;;  %v1962_v60 = vrot.slane %v850_v55, %v856_v52 }
 0x186   : > { %v853_v63 = vsub.f32 %v851_v57, %v852_v59  ;;  %v858_v0 = vmul.f32 %v1962_v60, %v1788_v29  ;;  %v859_v1 = vmul.f32 %v1962_v60, %v1790_v30  ;;  %v874_v4 = vmul.f32 %v1962_v60, %v1861_v18 }
 0x187   : > { %v875_v5 = vmul.f32 %v1962_v60, %v1866_v22  ;;  %v860_v7 = vmul.f32 %v1962_v60, %v1792_v31  ;;  %v861_v9 = vmul.f32 %v1962_v60, %v1796_v33  ;;  %v876_v11 = vmul.f32 %v1962_v60, %v1871_v27 }
 0x188   : > { %v1978_v12 = vrot.slane %v853_v63, %v856_v52  ;;  %v877_v29 = vmul.f32 %v1962_v60, %v1876_v34  ;;  %v862_v30 = vmul.f32 %v1962_v60, %v1800_v36  ;;  %v863_v18 = vmul.f32 %v1962_v60, %v1803_v38 }
 0x189   : > { %v878_v31 = vmul.f32 %v1962_v60, %v1881_v40  ;;  %v879_v33 = vmul.f32 %v1962_v60, %v1886_v46  ;;  %v864_v22 = vmul.f32 %v1962_v60, %v1807_v41  ;;  %v865_v27 = vmul.f32 %v1962_v60, %v1814_v45 }
 0x18a   : > { %v896_v34 = vadd.f32 %v1978_v12, %v858_v0  ;;  %v897_v15 = vadd.f32 %v1978_v12, %v859_v1  ;;  %v912_v36 = vadd.f32 %v1978_v12, %v874_v4  ;;  %v913_v38 = vadd.f32 %v1978_v12, %v875_v5 }
 0x18b   : > { %v898_v16 = vadd.f32 %v1978_v12, %v860_v7  ;;  %v899_v40 = vadd.f32 %v1978_v12, %v861_v9  ;;  %v914_v46 = vadd.f32 %v1978_v12, %v876_v11  ;;  %v915_v17 = vadd.f32 %v1978_v12, %v877_v29 }
 0x18c   : > { %v928_v41 = vmax.f32 %v896_v34, 0.0  ;;  %v929_v20 = vmax.f32 %v897_v15, 0.0  ;;  %v944_v21 = vmax.f32 %v912_v36, 0.0  ;;  %v945_v45 = vmax.f32 %v913_v38, 0.0 }
 0x18d   : > { %v930_v23 = vmax.f32 %v898_v16, 0.0  ;;  %v931_v26 = vmax.f32 %v899_v40, 0.0  ;;  %v946_v28 = vmax.f32 %v914_v46, 0.0  ;;  %v947_v24 = vmax.f32 %v915_v17, 0.0 }
 0x18e   : > { %v960_v35 = vpack.c.bf16 %v929_v20, %v928_v41  ;;  %v968_v37 = vpack.c.bf16 %v945_v45, %v944_v21  ;;  %v900_v39 = vadd.f32 %v1978_v12, %v862_v30  ;;  %v901_v43 = vadd.f32 %v1978_v12, %v863_v18 }
 0x18f   : > { %v961_v44 = vpack.c.bf16 %v931_v26, %v930_v23  ;;  %v969_v47 = vpack.c.bf16 %v947_v24, %v946_v28  ;;  %v916_v48 = vadd.f32 %v1978_v12, %v878_v31  ;;  %v917_v50 = vadd.f32 %v1978_v12, %v879_v33 }
 0x190   : > { %1488 = vmatprep.mubr.bf16.mxu0 %v960_v35  ;;  %1504 = vmatprep.mubr.bf16.mxu1 %v968_v37  ;;  %v932_v52 = vmax.f32 %v900_v39, 0.0  ;;  %v933_v54 = vmax.f32 %v901_v43, 0.0  ;;  %v902_v55 = vadd.f32 %v1978_v12, %v864_v22  ;;  %v903_v57 = vadd.f32 %v1978_v12, %v865_v27 }
 0x191   : > { %1489 = vmatmul.mubr.bf16.vlgmr.msra.gmra.mrb[0].mxu0 %v961_v44  ;;  %1505 = vmatmul.mubr.bf16.vlgmr.msra.gmra.mrb[0].mxu1 %v969_v47  ;;  %v948_v59 = vmax.f32 %v916_v48, 0.0  ;;  %v949_v63 = vmax.f32 %v917_v50, 0.0  ;;  %v880_v0 = vmul.f32 %v1962_v60, %v1891_v51  ;;  %v881_v1 = vmul.f32 %v1962_v60, %v1896_v56 }
 0x192   : > { %v962_v4 = vpack.c.bf16 %v933_v54, %v932_v52  ;;  %v934_v5 = vmax.f32 %v902_v55, 0.0  ;;  %v935_v7 = vmax.f32 %v903_v57, 0.0  ;;  %v866_v9 = vmul.f32 %v1962_v60, %v1820_v49 }
 0x193   : > { %v970_v11 = vpack.c.bf16 %v949_v63, %v948_v59  ;;  %v918_v29 = vadd.f32 %v1978_v12, %v880_v0  ;;  %v919_v30 = vadd.f32 %v1978_v12, %v881_v1  ;;  %v867_v18 = vmul.f32 %v1962_v60, %v1825_v53 }
 0x194   : > { %1492 = vmatprep.mubr.bf16.mxu0 %v962_v4  ;;  %v963_v31 = vpack.c.bf16 %v935_v7, %v934_v5  ;;  %v904_v51 = vadd.f32 %v1978_v12, %v866_v9  ;;  %v882_v56 = vmul.f32 %v1962_v60, %v1901_v61  ;;  %v883_v33 = vmul.f32 %v1962_v60, %v1906_v3 }
 0x195   : > { %1508 = vmatprep.mubr.bf16.mxu1 %v970_v11  ;;  %v950_v49 = vmax.f32 %v918_v29, 0.0  ;;  %v951_v22 = vmax.f32 %v919_v30, 0.0  ;;  %v905_v27 = vadd.f32 %v1978_v12, %v867_v18  ;;  %v868_v34 = vmul.f32 %v1962_v60, %v1831_v58 }
 0x196   : > { %v936_v15 = vmax.f32 %v904_v51, 0.0  ;;  %v920_v53 = vadd.f32 %v1978_v12, %v882_v56  ;;  %v921_v36 = vadd.f32 %v1978_v12, %v883_v33  ;;  %v869_v38 = vmul.f32 %v1962_v60, %v1836_v62 }
 0x197   : > { %v971_v61 = vpack.c.bf16 %v951_v22, %v950_v49  ;;  %v937_v16 = vmax.f32 %v905_v27, 0.0  ;;  %v906_v3 = vadd.f32 %v1978_v12, %v868_v34  ;;  %v884_v40 = vmul.f32 %v1962_v60, %v1911_v8 }
 0x198   : > { %v952_v46 = vmax.f32 %v920_v53, 0.0  ;;  %v953_v17 = vmax.f32 %v921_v36, 0.0  ;;  %v907_v41 = vadd.f32 %v1978_v12, %v869_v38  ;;  %v885_v58 = vmul.f32 %v1962_v60, %v1916_v13 }
 0x199   : > { %1493 = vmatmul.mubr.bf16.gmra.mrb[4].mxu0 %v963_v31  ;;  %1509 = vmatmul.mubr.bf16.gmra.mrb[4].mxu1 %v971_v61  ;;  %v964_v20 = vpack.c.bf16 %v937_v16, %v936_v15  ;;  %v938_v21 = vmax.f32 %v906_v3, 0.0  ;;  %v922_v62 = vadd.f32 %v1978_v12, %v884_v40  ;;  %v870_v45 = vmul.f32 %v1962_v60, %v1841_v2 }
 0x19a   : > { %v972_v23 = vpack.c.bf16 %v953_v17, %v952_v46  ;;  %v939_v26 = vmax.f32 %v907_v41, 0.0  ;;  %v923_v8 = vadd.f32 %v1978_v12, %v885_v58  ;;  %v871_v28 = vmul.f32 %v1962_v60, %v1846_v6 }
 0x19b   : > { %1496 = vmatprep.mubr.bf16.mxu0 %v964_v20  ;;  %v954_v24 = vmax.f32 %v922_v62, 0.0  ;;  %v908_v13 = vadd.f32 %v1978_v12, %v870_v45  ;;  %v886_v35 = vmul.f32 %v1962_v60, %v1921_v19  ;;  %v887_v37 = vmul.f32 %v1962_v60, %v1926_v25 }
 0x19c   : > { %1512 = vmatprep.mubr.bf16.mxu1 %v972_v23  ;;  %v965_v39 = vpack.c.bf16 %v939_v26, %v938_v21  ;;  %v955_v2 = vmax.f32 %v923_v8, 0.0  ;;  %v909_v43 = vadd.f32 %v1978_v12, %v871_v28  ;;  %v872_v44 = vmul.f32 %v1962_v60, %v1851_v10 }
 0x19d   : > { %v940_v47 = vmax.f32 %v908_v13, 0.0  ;;  %v924_v6 = vadd.f32 %v1978_v12, %v886_v35  ;;  %v925_v48 = vadd.f32 %v1978_v12, %v887_v37  ;;  %v873_v50 = vmul.f32 %v1962_v60, %v1856_v14 }
 0x19e   : > { %v973_v19 = vpack.c.bf16 %v955_v2, %v954_v24  ;;  %v941_v52 = vmax.f32 %v909_v43, 0.0  ;;  %v910_v25 = vadd.f32 %v1978_v12, %v872_v44  ;;  %v888_v54 = vmul.f32 %v1962_v60, %v1931_v32 }
 0x19f   : > { %v956_v55 = vmax.f32 %v924_v6, 0.0  ;;  %v957_v57 = vmax.f32 %v925_v48, 0.0  ;;  %v911_v59 = vadd.f32 %v1978_v12, %v873_v50  ;;  %v889_v10 = vmul.f32 %v1962_v60, %v1936_v42  ;;  %v2067_v42 = vld [vmem:[%s305_s13] ss:$0 sm:$0xff] }
 0x1a0   : > { %v966_v63 = vpack.c.bf16 %v941_v52, %v940_v47  ;;  %v926_v0 = vadd.f32 %v1978_v12, %v888_v54  ;;  %v942_v1 = vmax.f32 %v910_v25, 0.0 }
 0x1a1   : > { %1497 = vmatmul.mubr.bf16.gmra.mrb[8].mxu0 %v965_v39  ;;  %1513 = vmatmul.mubr.bf16.gmra.mrb[8].mxu1 %v973_v19  ;;  %v974_v14 = vpack.c.bf16 %v957_v57, %v956_v55  ;;  %v943_v4 = vmax.f32 %v911_v59, 0.0  ;;  %v927_v5 = vadd.f32 %v1978_v12, %v889_v10 }
 0x1a2   : > { %1500 = vmatprep.mubr.bf16.mxu0 %v966_v63  ;;  %v958_v32 = vmax.f32 %v926_v0, 0.0 }
 0x1a3   : > { %1516 = vmatprep.mubr.bf16.mxu1 %v974_v14  ;;  %v959_v7 = vmax.f32 %v927_v5, 0.0  ;;  %v967_v9 = vpack.c.bf16 %v943_v4, %v942_v1 }
 0x1a5   : > { %v975_v11 = vpack.c.bf16 %v959_v7, %v958_v32 }
 0x1a9   : > { %1501 = vmatmul.mubr.bf16.gmra.mrb[12].mxu0 %v967_v9  ;;  %1517 = vmatmul.mubr.bf16.gmra.mrb[12].mxu1 %v975_v11 }
 0x264   : > { %v1490_v60 = vpop.f32.mrb[0].mxu0  ;;  %v1506_v29 = vpop.f32.mrb[0].mxu1 }
 0x265   : > { %v2070_v30 = vadd.f32 %v1490_v60, %v2067_v42  ;;  %v2073_v12 = vadd.f32 %v1506_v29, %v2067_v42  ;;  %v1081_v18 = vpop.f32.mrb[1].mxu0  ;;  %v1145_v31 = vpop.f32.mrb[1].mxu1 }
 0x266   : > { %v2076_v51 = vadd.f32 %v2067_v42, %v1081_v18  ;;  %v2079_v56 = vadd.f32 %v2067_v42, %v1145_v31  ;;  %v1491_v33 = vpop.f32.mrb[2].mxu0  ;;  %v1507_v49 = vpop.f32.mrb[2].mxu1 }
 0x267   : > { %1210 = vst [vmem:[#allocation2 + $0x10] sm:$0xff] %v2070_v30  ;;  %1226 = vst [vmem:[#allocation2 + $0x90] sm:$0xff] %v2073_v12  ;;  %v2084_v22 = vadd.f32 %v1491_v33, %v2067_v42  ;;  %v2087_v27 = vadd.f32 %v1507_v49, %v2067_v42  ;;  %v1084_v34 = vpop.f32.mrb[3].mxu0  ;;  %v1148_v15 = vpop.f32.mrb[3].mxu1 }
 0x268   : > { %1208 = vst [vmem:[#allocation2] sm:$0xff] %v2076_v51  ;;  %1224 = vst [vmem:[#allocation2 + $0x80] sm:$0xff] %v2079_v56  ;;  %v2092_v53 = vadd.f32 %v2067_v42, %v1084_v34  ;;  %v2095_v36 = vadd.f32 %v2067_v42, %v1148_v15 }
 0x269   : > { %1211 = vst [vmem:[#allocation2 + $0x18] sm:$0xff] %v2084_v22  ;;  %1227 = vst [vmem:[#allocation2 + $0x98] sm:$0xff] %v2087_v27 }
 0x26a   : > { %1209 = vst [vmem:[#allocation2 + $0x8] sm:$0xff] %v2092_v53  ;;  %1225 = vst [vmem:[#allocation2 + $0x88] sm:$0xff] %v2095_v36 }
 0x26b   : > { %1244 = vst [vmem:[%s2280_s7] sm:$0xff] (!%p1372_p5), %v2076_v51  ;;  %1245 = vst [vmem:[%s2280_s7 + $0x8] sm:$0xff] (!%p1372_p5), %v2092_v53 }
 0x26c   : > { %v1494_v38 = vpop.f32.mrb[4].mxu0  ;;  %v1510_v61 = vpop.f32.mrb[4].mxu1  ;;  %1246 = vst [vmem:[%s2280_s7 + $0x10] sm:$0xff] (!%p1372_p5), %v2070_v30  ;;  %1247 = vst [vmem:[%s2280_s7 + $0x18] sm:$0xff] (!%p1372_p5), %v2084_v22 }
 0x26d   : > { %v2102_v16 = vadd.f32 %v1494_v38, %v2067_v42  ;;  %v2105_v3 = vadd.f32 %v1510_v61, %v2067_v42  ;;  %v1097_v40 = vpop.f32.mrb[5].mxu0  ;;  %v1161_v46 = vpop.f32.mrb[5].mxu1  ;;  %1260 = vst [vmem:[%s2280_s7 + $0x80] sm:$0xff] (!%p1372_p5), %v2079_v56  ;;  %1261 = vst [vmem:[%s2280_s7 + $0x88] sm:$0xff] (!%p1372_p5), %v2095_v36 }
 0x26e   : > { %v2108_v17 = vadd.f32 %v2067_v42, %v1097_v40  ;;  %v2111_v41 = vadd.f32 %v2067_v42, %v1161_v46  ;;  %v1495_v58 = vpop.f32.mrb[6].mxu0  ;;  %v1511_v20 = vpop.f32.mrb[6].mxu1  ;;  %1262 = vst [vmem:[%s2280_s7 + $0x90] sm:$0xff] (!%p1372_p5), %v2073_v12  ;;  %1263 = vst [vmem:[%s2280_s7 + $0x98] sm:$0xff] (!%p1372_p5), %v2087_v27 }
 0x26f   : > { %1214 = vst [vmem:[#allocation2 + $0x30] sm:$0xff] %v2102_v16  ;;  %1230 = vst [vmem:[#allocation2 + $0xb0] sm:$0xff] %v2105_v3  ;;  %v2116_v21 = vadd.f32 %v1495_v58, %v2067_v42  ;;  %v2119_v62 = vadd.f32 %v1511_v20, %v2067_v42  ;;  %v1100_v45 = vpop.f32.mrb[7].mxu0  ;;  %v1164_v23 = vpop.f32.mrb[7].mxu1 }
 0x270   : > { %1212 = vst [vmem:[#allocation2 + $0x20] sm:$0xff] %v2108_v17  ;;  %1228 = vst [vmem:[#allocation2 + $0xa0] sm:$0xff] %v2111_v41  ;;  %v1101_v26 = vadd.f32 %v2067_v42, %v1100_v45  ;;  %v2125_v8 = vadd.f32 %v2067_v42, %v1164_v23 }
 0x271   : > { %1215 = vst [vmem:[#allocation2 + $0x38] sm:$0xff] %v2116_v21  ;;  %1231 = vst [vmem:[#allocation2 + $0xb8] sm:$0xff] %v2119_v62 }
 0x272   : > { %1213 = vst [vmem:[#allocation2 + $0x28] sm:$0xff] %v1101_v26  ;;  %1229 = vst [vmem:[#allocation2 + $0xa8] sm:$0xff] %v2125_v8 }
 0x273   : > { %1248 = vst [vmem:[%s2280_s7 + $0x20] sm:$0xff] (!%p1372_p5), %v2108_v17  ;;  %1249 = vst [vmem:[%s2280_s7 + $0x28] sm:$0xff] (!%p1372_p5), %v1101_v26 }
 0x274   : > { %v1498_v28 = vpop.f32.mrb[8].mxu0  ;;  %v1514_v24 = vpop.f32.mrb[8].mxu1  ;;  %1250 = vst [vmem:[%s2280_s7 + $0x30] sm:$0xff] (!%p1372_p5), %v2102_v16  ;;  %1251 = vst [vmem:[%s2280_s7 + $0x38] sm:$0xff] (!%p1372_p5), %v2116_v21 }
 0x275   : > { %v1122_v13 = vadd.f32 %v1498_v28, %v2067_v42  ;;  %v2132_v35 = vadd.f32 %v1514_v24, %v2067_v42  ;;  %v1113_v37 = vpop.f32.mrb[9].mxu0  ;;  %v1177_v39 = vpop.f32.mrb[9].mxu1  ;;  %1264 = vst [vmem:[%s2280_s7 + $0xa0] sm:$0xff] (!%p1372_p5), %v2111_v41  ;;  %1265 = vst [vmem:[%s2280_s7 + $0xa8] sm:$0xff] (!%p1372_p5), %v2125_v8 }
 0x276   : > { %v1114_v2 = vadd.f32 %v2067_v42, %v1113_v37  ;;  %v2136_v43 = vadd.f32 %v2067_v42, %v1177_v39  ;;  %v1499_v44 = vpop.f32.mrb[10].mxu0  ;;  %v1515_v47 = vpop.f32.mrb[10].mxu1  ;;  %1266 = vst [vmem:[%s2280_s7 + $0xb0] sm:$0xff] (!%p1372_p5), %v2105_v3  ;;  %1267 = vst [vmem:[%s2280_s7 + $0xb8] sm:$0xff] (!%p1372_p5), %v2119_v62 }
 0x277   : > { %1218 = vst [vmem:[#allocation2 + $0x50] sm:$0xff] %v1122_v13  ;;  %1234 = vst [vmem:[#allocation2 + $0xd0] sm:$0xff] %v2132_v35  ;;  %v1125_v6 = vadd.f32 %v1499_v44, %v2067_v42  ;;  %v2141_v48 = vadd.f32 %v1515_v47, %v2067_v42  ;;  %v1116_v50 = vpop.f32.mrb[11].mxu0  ;;  %v1180_v19 = vpop.f32.mrb[11].mxu1 }
 0x278   : > { %1216 = vst [vmem:[#allocation2 + $0x40] sm:$0xff] %v1114_v2  ;;  %1232 = vst [vmem:[#allocation2 + $0xc0] sm:$0xff] %v2136_v43  ;;  %v1117_v52 = vadd.f32 %v2067_v42, %v1116_v50  ;;  %v1181_v25 = vadd.f32 %v2067_v42, %v1180_v19 }
 0x279   : > { %1219 = vst [vmem:[#allocation2 + $0x58] sm:$0xff] %v1125_v6  ;;  %1235 = vst [vmem:[#allocation2 + $0xd8] sm:$0xff] %v2141_v48 }
 0x27a   : > { %1217 = vst [vmem:[#allocation2 + $0x48] sm:$0xff] %v1117_v52  ;;  %1233 = vst [vmem:[#allocation2 + $0xc8] sm:$0xff] %v1181_v25 }
 0x27b   : > { %1252 = vst [vmem:[%s2280_s7 + $0x40] sm:$0xff] (!%p1372_p5), %v1114_v2  ;;  %1253 = vst [vmem:[%s2280_s7 + $0x48] sm:$0xff] (!%p1372_p5), %v1117_v52 }
 0x27c   : > { %v1502_v54 = vpop.f32.mrb[12].mxu0  ;;  %v1518_v55 = vpop.f32.mrb[12].mxu1  ;;  %1243 = sbr.rel (%p1372_p5) target bundleno = 647 (0x287), region = 56  ;;  %1254 = vst [vmem:[%s2280_s7 + $0x50] sm:$0xff] (!%p1372_p5), %v1122_v13  ;;  %1255 = vst [vmem:[%s2280_s7 + $0x58] sm:$0xff] (!%p1372_p5), %v1125_v6 }
 0x27d   : > { %v1138_v57 = vadd.f32 %v1502_v54, %v2067_v42  ;;  %v1202_v59 = vadd.f32 %v1518_v55, %v2067_v42  ;;  %v1129_v10 = vpop.f32.mrb[13].mxu0  ;;  %v1193_v63 = vpop.f32.mrb[13].mxu1  ;;  %1268 = vst [vmem:[%s2280_s7 + $0xc0] sm:$0xff] (!%p1372_p5), %v2136_v43  ;;  %1269 = vst [vmem:[%s2280_s7 + $0xc8] sm:$0xff] (!%p1372_p5), %v1181_v25 }
 0x27e   : > { %v1130_v0 = vadd.f32 %v2067_v42, %v1129_v10  ;;  %v1194_v14 = vadd.f32 %v2067_v42, %v1193_v63  ;;  %v1503_v1 = vpop.f32.mrb[14].mxu0  ;;  %v1519_v4 = vpop.f32.mrb[14].mxu1  ;;  %1270 = vst [vmem:[%s2280_s7 + $0xd0] sm:$0xff] (!%p1372_p5), %v2132_v35  ;;  %1271 = vst [vmem:[%s2280_s7 + $0xd8] sm:$0xff] (!%p1372_p5), %v2141_v48 }
 0x27f   : > { %1222 = vst [vmem:[#allocation2 + $0x70] sm:$0xff] %v1138_v57  ;;  %1238 = vst [vmem:[#allocation2 + $0xf0] sm:$0xff] %v1202_v59  ;;  %v1141_v5 = vadd.f32 %v1503_v1, %v2067_v42  ;;  %v1205_v32 = vadd.f32 %v1519_v4, %v2067_v42  ;;  %v1132_v7 = vpop.f32.mrb[15].mxu0  ;;  %v1196_v9 = vpop.f32.mrb[15].mxu1 }
 0x280   : > { %1220 = vst [vmem:[#allocation2 + $0x60] sm:$0xff] %v1130_v0  ;;  %1236 = vst [vmem:[#allocation2 + $0xe0] sm:$0xff] %v1194_v14  ;;  %v1133_v11 = vadd.f32 %v2067_v42, %v1132_v7  ;;  %v1197_v60 = vadd.f32 %v2067_v42, %v1196_v9 }
 0x281   : > { %1223 = vst [vmem:[#allocation2 + $0x78] sm:$0xff] %v1141_v5  ;;  %1239 = vst [vmem:[#allocation2 + $0xf8] sm:$0xff] %v1205_v32 }
 0x282   : > { %1221 = vst [vmem:[#allocation2 + $0x68] sm:$0xff] %v1133_v11  ;;  %1237 = vst [vmem:[#allocation2 + $0xe8] sm:$0xff] %v1197_v60 }
 0x283   : > { %1256 = vst [vmem:[%s2280_s7 + $0x60] sm:$0xff] %v1130_v0  ;;  %1257 = vst [vmem:[%s2280_s7 + $0x68] sm:$0xff] %v1133_v11 }
 0x284   : > { %1258 = vst [vmem:[%s2280_s7 + $0x70] sm:$0xff] %v1138_v57  ;;  %1259 = vst [vmem:[%s2280_s7 + $0x78] sm:$0xff] %v1141_v5 }
 0x285   : > { %1272 = vst [vmem:[%s2280_s7 + $0xe0] sm:$0xff] %v1194_v14  ;;  %1273 = vst [vmem:[%s2280_s7 + $0xe8] sm:$0xff] %v1197_v60 }
 0x286   : > { %1274 = vst [vmem:[%s2280_s7 + $0xf0] sm:$0xff] %v1202_v59  ;;  %1275 = vst [vmem:[%s2280_s7 + $0xf8] sm:$0xff] %v1205_v32 }
 0x287 PF: > { %s17_s24 = sadd.s32 1, %s1600_s24  }
 0x288   : > { %p14_p6 = scmp.ge.s32.totalorder %s17_s24, 4  }
 0x28a   :  { %16 = sbr.rel (!%p14_p6) target bundleno = 1 (0x1), region = 91 }

</bundles_post_ra>
